<compile_context>
chip_gen: v7x
topology: tpu7x:2x2x1
jax: 0.10.0
libtpu: 0.0.40
codegen_flags: <defaults>
</compile_context>

<pallas_src>
import math

import jax
import jax.numpy as jnp
from jax.experimental import pallas as pl
from jax.experimental.pallas import tpu as pltpu

LANE = 128     # TPU lane width (last-dim padding target)
M_TILE = 128   # batch-rows per grid step (fills MXU rows)


def _round_up(n, m):
    return ((n + m - 1) // m) * m


# ----------------------------------------------------------------------------
# Pallas kernels (one grid step = one M_TILE x *_pad slab; weights resident)
# ----------------------------------------------------------------------------
def _mlp_conti_kernel(x_ref, w1_ref, b1_ref, w2_ref, b2_ref, w3_ref, b3_ref,
                      o_ref):
    """Continuous-action branch: tanh -> tanh -> tanh (returns the mean)."""
    h = jnp.tanh(
        jnp.dot(x_ref[...], w1_ref[...], preferred_element_type=jnp.float32)
        + b1_ref[...])
    h = jnp.tanh(
        jnp.dot(h, w2_ref[...], preferred_element_type=jnp.float32)
        + b2_ref[...])
    h = jnp.tanh(
        jnp.dot(h, w3_ref[...], preferred_element_type=jnp.float32)
        + b3_ref[...])
    o_ref[...] = h.astype(o_ref.dtype)


def _mlp_discr_kernel(x_ref, w1_ref, b1_ref, w2_ref, b2_ref, w3_ref, b3_ref,
                      o_ref):
    """Discrete-action branch: relu -> relu -> max-shifted logits.

    Softmax + Categorical(probs) is equivalent to categorical sampling on the
    (shift-invariant) logits, so the exp/sum/div stays out of the kernel.
    """
    h = jnp.maximum(
        jnp.dot(x_ref[...], w1_ref[...], preferred_element_type=jnp.float32)
        + b1_ref[...], 0.0)
    h = jnp.maximum(
        jnp.dot(h, w2_ref[...], preferred_element_type=jnp.float32)
        + b2_ref[...], 0.0)
    logits = (jnp.dot(h, w3_ref[...], preferred_element_type=jnp.float32)
              + b3_ref[...])
    logits = logits - jnp.max(logits, axis=-1, keepdims=True)
    o_ref[...] = logits.astype(o_ref.dtype)


def _build_mlp_call(kernel, n_tiles, s_pad, h_pad, a_pad):
    """Build the pallas_call callable once for a given padded batch size."""
    def wspec(shape):
        # Constant index map -> weight/bias blocks DMA'd once, VMEM-resident
        # across all batch-tile grid steps.
        return pl.BlockSpec(shape, lambda i: (0, 0))

    return pl.pallas_call(
        kernel,
        out_shape=jax.ShapeDtypeStruct((n_tiles * M_TILE, a_pad), jnp.float32),
        grid=(n_tiles,),
        in_specs=[
            pl.BlockSpec((M_TILE, s_pad), lambda i: (i, 0)),   # x tile streams
            wspec((s_pad, h_pad)), wspec((1, h_pad)),
            wspec((h_pad, h_pad)), wspec((1, h_pad)),
            wspec((h_pad, a_pad)), wspec((1, a_pad)),
        ],
        out_specs=pl.BlockSpec((M_TILE, a_pad), lambda i: (i, 0)),
        compiler_params=pltpu.CompilerParams(
            dimension_semantics=("parallel",)),
    )


# ----------------------------------------------------------------------------
# Model wrapper (parameter setup + sampling glue, all under one jax.jit)
# ----------------------------------------------------------------------------
class ModelFF:
    def __init__(self, state_size, action_size, hidden_size, action_type,
                 key):
        assert action_type in ("conti", "discr")
        self.state_size = state_size
        self.action_size = action_size
        self.hidden_size = hidden_size
        self.action_type = action_type

        self.s_pad = _round_up(state_size, LANE)
        self.h_pad = _round_up(hidden_size, LANE)
        self.a_pad = _round_up(action_size, LANE)

        def init_linear(k, fan_in, fan_out, pad_in, pad_out):
            # Mimic torch.nn.Linear default init: U(-1/sqrt(in), 1/sqrt(in)).
            # Weights stored (in, out) so the kernel computes y = x @ W + b.
            kw, kb = jax.random.split(k)
            bound = 1.0 / math.sqrt(fan_in)
            w = jax.random.uniform(kw, (fan_in, fan_out), jnp.float32,
                                   -bound, bound)
            b = jax.random.uniform(kb, (fan_out,), jnp.float32,
                                   -bound, bound)
            # Zero-pad to lane-dense shapes; padded rows/cols never contribute.
            w_p = jnp.zeros((pad_in, pad_out), jnp.float32)
            w_p = w_p.at[:fan_in, :fan_out].set(w)
            b_p = jnp.zeros((1, pad_out), jnp.float32)
            b_p = b_p.at[0, :fan_out].set(b)
            return w_p, b_p

        k1, k2, k3 = jax.random.split(key, 3)
        w1, b1 = init_linear(k1, state_size, hidden_size, self.s_pad,
                             self.h_pad)
        w2, b2 = init_linear(k2, hidden_size, hidden_size, self.h_pad,
                             self.h_pad)
        w3, b3 = init_linear(k3, hidden_size, action_size, self.h_pad,
                             self.a_pad)
        self.params = (w1, b1, w2, b2, w3, b3)

        # One compiled forward per distinct batch size (built lazily, reused).
        self._fwd_cache = {}

    def _get_forward(self, batch):
        fwd = self._fwd_cache.get(batch)
        if fwd is not None:
            return fwd

        m_pad = _round_up(max(batch, 1), M_TILE)
        n_tiles = m_pad // M_TILE
        kernel = (_mlp_conti_kernel if self.action_type == "conti"
                  else _mlp_discr_kernel)
        mlp = _build_mlp_call(kernel, n_tiles, self.s_pad, self.h_pad,
                              self.a_pad)

        state_size = self.state_size
        action_size = self.action_size
        action_type = self.action_type
        s_pad = self.s_pad

        @jax.jit
        def fwd(x, params, sample_key):
            # x: (batch, state_size) f32 -> pad rows/lanes to the tiled shape.
            x_p = jnp.zeros((m_pad, s_pad), jnp.float32)
            x_p = x_p.at[:batch, :state_size].set(x)
            out = mlp(x_p, *params)[:batch, :action_size]
            if action_type == "conti":
                # Normal(mean, 0.1) sample, clamped to [-1, 1].
                # TODO(synk): could fold noise+clip into the kernel with
                # pltpu.prng_seed/stateful_normal; kept in-jit for clarity.
                noise = 0.1 * jax.random.normal(sample_key, out.shape,
                                                jnp.float32)
                return jnp.clip(out + noise, -1.0, 1.0)
            # Categorical sample directly from (shifted) logits.
            return jax.random.categorical(sample_key, out, axis=-1)

        self._fwd_cache[batch] = fwd
        return fwd

    def forward(self, x, hidden_threshold, sample_key):
        x = jnp.asarray(x, jnp.float32)
        if x.ndim == 1:
            x = x.reshape(1, self.state_size)       # matches x.view((1, S))
        batch = x.shape[0]
        action = self._get_forward(batch)(x, self.params, sample_key)
        return action, hidden_threshold


# ----------------------------------------------------------------------------
if __name__ == "__main__":
    state_size = 16
    action_size = 4
    hidden_size = 32

    root = jax.random.PRNGKey(0)
    (k_params_c, k_params_d, k_x, k_xb,
     k_samp_c, k_samp_d, k_samp_b) = jax.random.split(root, 7)

    x = jax.random.normal(k_x, (state_size,), jnp.float32)
    x_batch = jax.random.normal(k_xb, (8, state_size), jnp.float32)
    hidden_threshold = jnp.zeros((hidden_size,), jnp.float32)

    # Continuous-action branch (gym Box) -> tanh MLP + clipped Normal sample
    model_c = ModelFF(state_size, action_size, hidden_size, "conti",
                      k_params_c)
    action_c, ht_c = model_c.forward(x, hidden_threshold, k_samp_c)
    jax.block_until_ready(action_c)
    assert action_c.shape == (1, action_size)
    assert bool(jnp.all(jnp.abs(action_c) <= 1.0))

    # Same model, batched rollout path (grid over batch tiles)
    action_cb, _ = model_c.forward(x_batch, hidden_threshold, k_samp_b)
    jax.block_until_ready(action_cb)
    assert action_cb.shape == (8, action_size)
    assert bool(jnp.all(jnp.abs(action_cb) <= 1.0))

    # Discrete-action branch -> relu MLP + logits + Categorical sample
    model_d = ModelFF(state_size, action_size, hidden_size, "discr",
                      k_params_d)
    action_d, ht_d = model_d.forward(x, hidden_threshold, k_samp_d)
    jax.block_until_ready(action_d)
    assert action_d.shape == (1,)
    assert 0 <= int(action_d[0]) < action_size

    # Second call with the same batch size reuses the cached jitted forward
    # (no re-trace, single compiled dispatch).
    action_c2, _ = model_c.forward(x, hidden_threshold, k_samp_c)
    jax.block_until_ready(action_c2)
    assert bool(jnp.allclose(action_c, action_c2))

    print("KERNEL_OK")
</pallas_src>

<mosaic_0001>
module attributes {stable_mosaic.version = 11 : i64} {
  func.func @_mlp_conti_kernel(%arg0: i32, %arg1: memref<128x128xf32, #tpu.memory_space<vmem>>, %arg2: memref<128x128xf32, #tpu.memory_space<vmem>>, %arg3: memref<1x128xf32, #tpu.memory_space<vmem>>, %arg4: memref<128x128xf32, #tpu.memory_space<vmem>>, %arg5: memref<1x128xf32, #tpu.memory_space<vmem>>, %arg6: memref<128x128xf32, #tpu.memory_space<vmem>>, %arg7: memref<1x128xf32, #tpu.memory_space<vmem>>, %arg8: memref<128x128xf32, #tpu.memory_space<vmem>>) attributes {dimension_semantics = [#tpu.dimension_semantics<parallel>], iteration_bounds = array<i64: 1>, scalar_prefetch = 0 : i64, scratch_operands = 0 : i64, tpu.core_type = #tpu.core_type<tc>, window_params = [{transform_indices = @transform_0, window_bounds = array<i64: 128, 128>}, {pipeline_mode = #tpu.pipeline_mode<synchronous>, transform_indices = @transform_1, window_bounds = array<i64: 128, 128>}, {pipeline_mode = #tpu.pipeline_mode<synchronous>, transform_indices = @transform_2, window_bounds = array<i64: 1, 128>}, {pipeline_mode = #tpu.pipeline_mode<synchronous>, transform_indices = @transform_3, window_bounds = array<i64: 128, 128>}, {pipeline_mode = #tpu.pipeline_mode<synchronous>, transform_indices = @transform_4, window_bounds = array<i64: 1, 128>}, {pipeline_mode = #tpu.pipeline_mode<synchronous>, transform_indices = @transform_5, window_bounds = array<i64: 128, 128>}, {pipeline_mode = #tpu.pipeline_mode<synchronous>, transform_indices = @transform_6, window_bounds = array<i64: 1, 128>}, {transform_indices = @transform_7, window_bounds = array<i64: 128, 128>}]} {
    %c0 = arith.constant 0 : index
    %c0_0 = arith.constant 0 : index
    %0 = vector.load %arg1[%c0, %c0_0] : memref<128x128xf32, #tpu.memory_space<vmem>>, vector<128x128xf32>
    %c0_1 = arith.constant 0 : index
    %c0_2 = arith.constant 0 : index
    %1 = vector.load %arg2[%c0_1, %c0_2] : memref<128x128xf32, #tpu.memory_space<vmem>>, vector<128x128xf32>
    %cst = arith.constant dense<0.000000e+00> : vector<128x128xf32>
    %2 = tpu.matmul %0, %1, %cst {dimension_numbers = #tpu.dot_dimension_numbers<[1], [0], [0], [1], [0, 0, 1, 1], [], []>} : vector<128x128xf32>, vector<128x128xf32>, vector<128x128xf32> -> vector<128x128xf32>
    %c0_3 = arith.constant 0 : index
    %c0_4 = arith.constant 0 : index
    %3 = vector.load %arg3[%c0_3, %c0_4] : memref<1x128xf32, #tpu.memory_space<vmem>>, vector<1x128xf32>
    %4 = vector.broadcast %3 : vector<1x128xf32> to vector<128x128xf32>
    %5 = arith.addf %2, %4 : vector<128x128xf32>
    %6 = math.tanh %5 : vector<128x128xf32>
    %c0_5 = arith.constant 0 : index
    %c0_6 = arith.constant 0 : index
    %7 = vector.load %arg4[%c0_5, %c0_6] : memref<128x128xf32, #tpu.memory_space<vmem>>, vector<128x128xf32>
    %cst_7 = arith.constant dense<0.000000e+00> : vector<128x128xf32>
    %8 = tpu.matmul %6, %7, %cst_7 {dimension_numbers = #tpu.dot_dimension_numbers<[1], [0], [0], [1], [0, 0, 1, 1], [], []>} : vector<128x128xf32>, vector<128x128xf32>, vector<128x128xf32> -> vector<128x128xf32>
    %c0_8 = arith.constant 0 : index
    %c0_9 = arith.constant 0 : index
    %9 = vector.load %arg5[%c0_8, %c0_9] : memref<1x128xf32, #tpu.memory_space<vmem>>, vector<1x128xf32>
    %10 = vector.broadcast %9 : vector<1x128xf32> to vector<128x128xf32>
    %11 = arith.addf %8, %10 : vector<128x128xf32>
    %12 = math.tanh %11 : vector<128x128xf32>
    %c0_10 = arith.constant 0 : index
    %c0_11 = arith.constant 0 : index
    %13 = vector.load %arg6[%c0_10, %c0_11] : memref<128x128xf32, #tpu.memory_space<vmem>>, vector<128x128xf32>
    %cst_12 = arith.constant dense<0.000000e+00> : vector<128x128xf32>
    %14 = tpu.matmul %12, %13, %cst_12 {dimension_numbers = #tpu.dot_dimension_numbers<[1], [0], [0], [1], [0, 0, 1, 1], [], []>} : vector<128x128xf32>, vector<128x128xf32>, vector<128x128xf32> -> vector<128x128xf32>
    %c0_13 = arith.constant 0 : index
    %c0_14 = arith.constant 0 : index
    %15 = vector.load %arg7[%c0_13, %c0_14] : memref<1x128xf32, #tpu.memory_space<vmem>>, vector<1x128xf32>
    %16 = vector.broadcast %15 : vector<1x128xf32> to vector<128x128xf32>
    %17 = arith.addf %14, %16 : vector<128x128xf32>
    %18 = math.tanh %17 : vector<128x128xf32>
    %c0_15 = arith.constant 0 : index
    %c0_16 = arith.constant 0 : index
    %19 = vector.load %arg8[%c0_15, %c0_16] : memref<128x128xf32, #tpu.memory_space<vmem>>, vector<128x128xf32>
    tpu.vector_store %arg8[%c0_15, %c0_16], %18 {strides = array<i32>} : memref<128x128xf32, #tpu.memory_space<vmem>>, vector<128x128xf32>,
    return
  }
  func.func @transform_0(%arg0: i32) -> (i32, i32) {
    %c0_i32 = arith.constant 0 : i32
    %c0_i32_0 = arith.constant 0 : i32
    return %arg0, %c0_i32 : i32, i32
  }
  func.func @transform_1(%arg0: i32) -> (i32, i32) {
    %c0_i32 = arith.constant 0 : i32
    %c0_i32_0 = arith.constant 0 : i32
    %c0_i32_1 = arith.constant 0 : i32
    return %c0_i32, %c0_i32_0 : i32, i32
  }
  func.func @transform_2(%arg0: i32) -> (i32, i32) {
    %c0_i32 = arith.constant 0 : i32
    %c0_i32_0 = arith.constant 0 : i32
    %c0_i32_1 = arith.constant 0 : i32
    return %c0_i32, %c0_i32_0 : i32, i32
  }
  func.func @transform_3(%arg0: i32) -> (i32, i32) {
    %c0_i32 = arith.constant 0 : i32
    %c0_i32_0 = arith.constant 0 : i32
    %c0_i32_1 = arith.constant 0 : i32
    return %c0_i32, %c0_i32_0 : i32, i32
  }
  func.func @transform_4(%arg0: i32) -> (i32, i32) {
    %c0_i32 = arith.constant 0 : i32
    %c0_i32_0 = arith.constant 0 : i32
    %c0_i32_1 = arith.constant 0 : i32
    return %c0_i32, %c0_i32_0 : i32, i32
  }
  func.func @transform_5(%arg0: i32) -> (i32, i32) {
    %c0_i32 = arith.constant 0 : i32
    %c0_i32_0 = arith.constant 0 : i32
    %c0_i32_1 = arith.constant 0 : i32
    return %c0_i32, %c0_i32_0 : i32, i32
  }
  func.func @transform_6(%arg0: i32) -> (i32, i32) {
    %c0_i32 = arith.constant 0 : i32
    %c0_i32_0 = arith.constant 0 : i32
    %c0_i32_1 = arith.constant 0 : i32
    return %c0_i32, %c0_i32_0 : i32, i32
  }
  func.func @transform_7(%arg0: i32) -> (i32, i32) {
    %c0_i32 = arith.constant 0 : i32
    %c0_i32_0 = arith.constant 0 : i32
    return %arg0, %c0_i32 : i32, i32
  }
}

</mosaic_0001>

<bundles_post_ra>
// kernel: fwd.1
= control target key start
LH: loop header
LB: loop body
LE: loop exit
PB: predicated region body
PF: predicated region fallthrough
CT: control target
= control target key end

     0   :  { %12 = vsyncpa [#allocation3], 0  ;;  %s1458_s0 = inlined_call_operand.vmem [shape: f32[128,128], index: 0, kind: input, shape index: {}]   ;;  %s1459_s1 = inlined_call_operand.vmem [shape: f32[128,128], index: 1, kind: input, shape index: {}]   ;;  %s1460_s2 = inlined_call_operand.vmem [shape: f32[1,128], index: 2, kind: input, shape index: {}]   ;;  %s1461_s3 = inlined_call_operand.hbm [shape: f32[128,128], index: 3, kind: input, shape index: {}]   ;;  %s1462_s4 = inlined_call_operand.vmem [shape: f32[1,128], index: 4, kind: input, shape index: {}]   ;;  %s1463_s5 = inlined_call_operand.hbm [shape: f32[128,128], index: 5, kind: input, shape index: {}]   ;;  %s1464_s6 = inlined_call_operand.vmem [shape: f32[1,128], index: 6, kind: input, shape index: {}]   ;;  %s1465_s7 = inlined_call_operand.vmem [shape: f32[128,128], index: 7, kind: output, shape index: {}]  }
   0x1   :  { %13 = vsyncpa [#allocation5], 0  ;;  %s1171_s24 = smov [#allocation2]   ;;  %s1123_s28 = scalar_lea.hbm %s1461_s3, 2048 }
   0x2   :  { %s25_s25 = sshll.u32 %s1171_s24, 4  ;;  %p1124_p0 = scmp.ne.s32.totalorder %s1461_s3, %s1123_s28  ;;  %s26_s25 = int_to_ptr.vmem [resolvable:$true] %s25_s25 }
   0x3   :  { %p1127_p1 = scmp.lt.u32.totalorder %s1123_s28, %s1461_s3 }
   0x5   :  { %p1129_p2 = pnand %p1127_p1, %p1124_p0 }
   0x7   :  { %1132 = shalt.err (!%p1129_p2)
}
   0x8   :  { %s1133_s10 = scalar_lea.vmem %s26_s25, 2048  ;;  %p1138_p4 = scmp.lt.s32.totalorder %s26_s25, %s26_s25 }
   0x9   :  { %p1134_p3 = scmp.ne.s32.totalorder %s26_s25, %s1133_s10  ;;  %p1139_p5 = scmp.lt.s32.totalorder %s1133_s10, %s1133_s10 }
   0xb   :  { %p1140_p6 = por %p1139_p5, %p1138_p4 }
   0xd   :  { %p1141_p7 = pnand %p1140_p6, %p1134_p3 }
   0xf   :  { %1144 = shalt.err (!%p1141_p7)
}
  0x10   :  { %s1172_s11 = smov 128   ;;  %s1173_s12 = smov 8  }
  0x11   :  { %31 = dma.hbm_to_vmem [thread:$0]  %s1461_s3, 2048, %s26_s25, [#allocation3], %s1172_s11, %s1172_s11, %s1173_s12  }
  0x12   :  { %s1174_s15 = smov [#allocation4]   ;;  %s1145_s19 = scalar_lea.hbm %s1463_s5, 2048 }
  0x13   :  { %s39_s16 = sshll.u32 %s1174_s15, 4  ;;  %p1146_p8 = scmp.ne.s32.totalorder %s1463_s5, %s1145_s19  ;;  %s40_s16 = int_to_ptr.vmem [resolvable:$true] %s39_s16 }
  0x14   :  { %p1149_p9 = scmp.lt.u32.totalorder %s1145_s19, %s1463_s5 }
  0x16   :  { %p1151_p10 = pnand %p1149_p9, %p1146_p8 }
  0x18   :  { %1154 = shalt.err (!%p1151_p10)
}
  0x19   :  { %s1155_s24 = scalar_lea.vmem %s40_s16, 2048  ;;  %p1160_p12 = scmp.lt.s32.totalorder %s40_s16, %s40_s16 }
  0x1a   :  { %p1156_p11 = scmp.ne.s32.totalorder %s40_s16, %s1155_s24  ;;  %p1161_p13 = scmp.lt.s32.totalorder %s1155_s24, %s1155_s24 }
  0x1c   :  { %p1162_p0 = por %p1161_p13, %p1160_p12 }
  0x1e   :  { %p1163_p1 = pnand %p1162_p0, %p1156_p11 }
  0x20   :  { %1166 = shalt.err (!%p1163_p1)
}
  0x21   :  { %45 = dma.hbm_to_vmem [thread:$0]  %s1463_s5, 2048, %s40_s16, [#allocation5], %s1172_s11, %s1172_s11, %s1173_s12  }
  0x22   :  { %1167 = dma.done.wait [#allocation3], 2048  }
  0x23   :  { %1168 = vsyncadd [#allocation3], 4294965248 }
  0x24   :  { %1169 = dma.done.wait [#allocation5], 2048  }
  0x25   :  { %1170 = vsyncadd [#allocation5], 4294965248  ;;  %v70_v0 = vld [vmem:[%s1459_s1] sm:$0xff]  ;;  %v71_v1 = vld [vmem:[%s1459_s1 + $0x8] sm:$0xff] }
  0x26   :  { %v72_v2 = vld [vmem:[%s1459_s1 + $0x10] sm:$0xff]  ;;  %v911_v3 = vpack.c.bf16 %v71_v1, %v70_v0  ;;  %v73_v4 = vld [vmem:[%s1459_s1 + $0x18] sm:$0xff]  ;;  %v74_v6 = vld [vmem:[%s1459_s1 + $0x20] sm:$0xff] }
  0x27   :  { %v915_v5 = vpack.c.bf16 %v73_v4, %v72_v2  ;;  %v75_v7 = vld [vmem:[%s1459_s1 + $0x28] sm:$0xff]  ;;  %v54_v9 = vld [vmem:[%s1458_s0] sm:$0xff]  ;;  %v76_v10 = vld [vmem:[%s1459_s1 + $0x30] sm:$0xff] }
  0x28   :  { %912 = vmatprep.subr.bf16.mxu0 %v911_v3  ;;  %v919_v8 = vpack.c.bf16 %v75_v7, %v74_v6  ;;  %v77_v11 = vld [vmem:[%s1459_s1 + $0x38] sm:$0xff]  ;;  %775 = vmatprep.mubr.f32.mxu0 %v54_v9  ;;  %v78_v13 = vld [vmem:[%s1459_s1 + $0x40] sm:$0xff]  ;;  %v79_v14 = vld [vmem:[%s1459_s1 + $0x48] sm:$0xff] }
  0x29   :  { %914 = vmatpush3.bf16.msra.mxu0 %v911_v3  ;;  %v923_v12 = vpack.c.bf16 %v77_v11, %v76_v10  ;;  %v254_v15 = vld [vmem:[#allocation2] sm:$0xff]  ;;  %v255_v16 = vld [vmem:[#allocation2 + $0x8] sm:$0xff]  ;;  %v256_v17 = vld [vmem:[#allocation2 + $0x10] sm:$0xff]  ;;  %v927_v21 = vpack.c.bf16 %v79_v14, %v78_v13 }
  0x2a   :  { %916 = vmatprep.subr.bf16.mxu0 %v915_v5  ;;  %v257_v18 = vld [vmem:[#allocation2 + $0x18] sm:$0xff]  ;;  %v943_v19 = vpack.c.bf16 %v255_v16, %v254_v15  ;;  %v258_v22 = vld [vmem:[#allocation2 + $0x20] sm:$0xff]  ;;  %v259_v23 = vld [vmem:[#allocation2 + $0x28] sm:$0xff] }
  0x2b   :  { %v947_v20 = vpack.c.bf16 %v257_v18, %v256_v17  ;;  %v80_v24 = vld [vmem:[%s1459_s1 + $0x50] sm:$0xff]  ;;  %v81_v25 = vld [vmem:[%s1459_s1 + $0x58] sm:$0xff]  ;;  %v951_v26 = vpack.c.bf16 %v259_v23, %v258_v22  ;;  %v82_v30 = vld [vmem:[%s1459_s1 + $0x60] sm:$0xff] }
  0x2c   :  { %944 = vmatprep.subr.bf16.mxu1 %v943_v19  ;;  %v931_v27 = vpack.c.bf16 %v81_v25, %v80_v24  ;;  %v260_v28 = vld [vmem:[#allocation2 + $0x30] sm:$0xff]  ;;  %v261_v29 = vld [vmem:[#allocation2 + $0x38] sm:$0xff]  ;;  %v83_v31 = vld [vmem:[%s1459_s1 + $0x68] sm:$0xff] }
  0x2d   :  { %918 = vmatpush3.bf16.msra.mxu0 %v915_v5  ;;  %946 = vmatpush3.bf16.msra.mxu1 %v943_v19  ;;  %v955_v32 = vpack.c.bf16 %v261_v29, %v260_v28  ;;  %v935_v33 = vpack.c.bf16 %v83_v31, %v82_v30  ;;  %v84_v34 = vld [vmem:[%s1459_s1 + $0x70] sm:$0xff]  ;;  %v85_v35 = vld [vmem:[%s1459_s1 + $0x78] sm:$0xff]  ;;  %v55_v37 = vld [vmem:[%s1458_s0 + $0x8] sm:$0xff] }
  0x2e   :  { %920 = vmatprep.subr.bf16.mxu0 %v919_v8  ;;  %948 = vmatprep.subr.bf16.mxu1 %v947_v20  ;;  %v939_v36 = vpack.c.bf16 %v85_v35, %v84_v34  ;;  %v56_v38 = vld [vmem:[%s1458_s0 + $0x10] sm:$0xff]  ;;  %v57_v39 = vld [vmem:[%s1458_s0 + $0x18] sm:$0xff]  ;;  %v58_v40 = vld [vmem:[%s1458_s0 + $0x20] sm:$0xff] }
  0x2f   :  { %v59_v41 = vld [vmem:[%s1458_s0 + $0x28] sm:$0xff]  ;;  %v60_v42 = vld [vmem:[%s1458_s0 + $0x30] sm:$0xff]  ;;  %v61_v43 = vld [vmem:[%s1458_s0 + $0x38] sm:$0xff] }
  0x30   :  { %v62_v44 = vld [vmem:[%s1458_s0 + $0x40] sm:$0xff]  ;;  %v63_v45 = vld [vmem:[%s1458_s0 + $0x48] sm:$0xff]  ;;  %v64_v46 = vld [vmem:[%s1458_s0 + $0x50] sm:$0xff] }
  0x31   :  { %922 = vmatpush3.bf16.msra.mxu0 %v919_v8  ;;  %950 = vmatpush3.bf16.msra.mxu1 %v947_v20  ;;  %v65_v47 = vld [vmem:[%s1458_s0 + $0x58] sm:$0xff]  ;;  %v66_v48 = vld [vmem:[%s1458_s0 + $0x60] sm:$0xff]  ;;  %v67_v49 = vld [vmem:[%s1458_s0 + $0x68] sm:$0xff] }
  0x32   :  { %924 = vmatprep.subr.bf16.mxu0 %v923_v12  ;;  %952 = vmatprep.subr.bf16.mxu1 %v951_v26  ;;  %v68_v50 = vld [vmem:[%s1458_s0 + $0x70] sm:$0xff]  ;;  %v69_v51 = vld [vmem:[%s1458_s0 + $0x78] sm:$0xff]  ;;  %v262_v52 = vld [vmem:[#allocation2 + $0x40] sm:$0xff] }
  0x33   :  { %v263_v53 = vld [vmem:[#allocation2 + $0x48] sm:$0xff]  ;;  %v264_v55 = vld [vmem:[#allocation2 + $0x50] sm:$0xff]  ;;  %v265_v56 = vld [vmem:[#allocation2 + $0x58] sm:$0xff] }
  0x34   :  { %v959_v54 = vpack.c.bf16 %v263_v53, %v262_v52  ;;  %v963_v57 = vpack.c.bf16 %v265_v56, %v264_v55  ;;  %v266_v58 = vld [vmem:[#allocation2 + $0x60] sm:$0xff]  ;;  %v267_v59 = vld [vmem:[#allocation2 + $0x68] sm:$0xff]  ;;  %v268_v61 = vld [vmem:[#allocation2 + $0x70] sm:$0xff] }
  0x35   :  { %926 = vmatpush3.bf16.msra.mxu0 %v923_v12  ;;  %954 = vmatpush3.bf16.msra.mxu1 %v951_v26  ;;  %v967_v60 = vpack.c.bf16 %v267_v59, %v266_v58  ;;  %v269_v62 = vld [vmem:[#allocation2 + $0x78] sm:$0xff]  ;;  %v438_v0 = vld [vmem:[#allocation4] sm:$0xff]  ;;  %v439_v1 = vld [vmem:[#allocation4 + $0x8] sm:$0xff] }
  0x36   :  { %928 = vmatprep.subr.bf16.mxu0 %v927_v21  ;;  %956 = vmatprep.subr.bf16.mxu1 %v955_v32  ;;  %v971_v63 = vpack.c.bf16 %v269_v62, %v268_v61  ;;  %v440_v2 = vld [vmem:[#allocation4 + $0x10] sm:$0xff]  ;;  %v975_v3 = vpack.c.bf16 %v439_v1, %v438_v0  ;;  %v441_v4 = vld [vmem:[#allocation4 + $0x18] sm:$0xff]  ;;  %v442_v6 = vld [vmem:[#allocation4 + $0x20] sm:$0xff] }
  0x37   :  { %v979_v5 = vpack.c.bf16 %v441_v4, %v440_v2  ;;  %v443_v7 = vld [vmem:[#allocation4 + $0x28] sm:$0xff]  ;;  %v444_v9 = vld [vmem:[#allocation4 + $0x30] sm:$0xff]  ;;  %v445_v10 = vld [vmem:[#allocation4 + $0x38] sm:$0xff] }
  0x38   :  { %v1335_v8 = vpack.c.bf16 %v443_v7, %v442_v6  ;;  %v1338_v11 = vpack.c.bf16 %v445_v10, %v444_v9  ;;  %v1346_v12 = vld [vmem:[%s1460_s2] ss:$0 sm:$0xff]  ;;  %v447_v62 = vld [vmem:[#allocation4 + $0x48] sm:$0xff]  ;;  %v448_v0 = vld [vmem:[#allocation4 + $0x50] sm:$0xff] }
  0x39   :  { %930 = vmatpush3.bf16.msra.mxu0 %v927_v21  ;;  %958 = vmatpush3.bf16.msra.mxu1 %v955_v32  ;;  %v446_v61 = vld [vmem:[#allocation4 + $0x40] sm:$0xff]  ;;  %v449_v1 = vld [vmem:[#allocation4 + $0x58] sm:$0xff]  ;;  %v451_v4 = vld [vmem:[#allocation4 + $0x68] sm:$0xff] }
  0x3a   :  { %932 = vmatprep.subr.bf16.mxu0 %v931_v27  ;;  %960 = vmatprep.subr.bf16.mxu1 %v959_v54  ;;  %v995_v2 = vpack.c.bf16 %v449_v1, %v448_v0  ;;  %v452_v6 = vld [vmem:[#allocation4 + $0x70] sm:$0xff]  ;;  %v453_v7 = vld [vmem:[#allocation4 + $0x78] sm:$0xff]  ;;  %v1371_v9 = vld [vmem:[%s1462_s4] ss:$0 sm:$0xff] }
  0x3d   :  { %934 = vmatpush3.bf16.msra.mxu0 %v931_v27  ;;  %962 = vmatpush3.bf16.msra.mxu1 %v959_v54 }
  0x3e   :  { %936 = vmatprep.subr.bf16.mxu0 %v935_v33  ;;  %964 = vmatprep.subr.bf16.mxu1 %v963_v57 }
  0x41   :  { %938 = vmatpush3.bf16.msra.mxu0 %v935_v33  ;;  %966 = vmatpush3.bf16.msra.mxu1 %v963_v57 }
  0x42   :  { %940 = vmatprep.subr.bf16.mxu0 %v939_v36  ;;  %968 = vmatprep.subr.bf16.mxu1 %v967_v60 }
  0x45   :  { %942 = vmatpush3.bf16.msra.mxu0 %v939_v36  ;;  %970 = vmatpush3.bf16.msra.mxu1 %v967_v60 }
  0x46   :  { %972 = vmatprep.subr.bf16.mxu1 %v971_v63  ;;  %976 = vmatprep.subr.bf16.mxu0 %v975_v3 }
  0x48   :  { %776 = vmatmul.mubr.f32.vlgmr.msra.gmra.mrb[0].mxu0 %v55_v37 }
  0x49   :  { %778 = vmatprep.mubr.f32.mxu0 %v56_v38  ;;  %974 = vmatpush3.bf16.msra.mxu1 %v971_v63  ;;  %v991_v63 = vpack.c.bf16 %v447_v62, %v446_v61 }
  0x4a   :  { %1007 = vmatprep.subr.bf16.mxu1 %v975_v3  ;;  %978 = vmatpush3.bf16.msra.mxu0 %v975_v3 }
  0x4b   :  { %980 = vmatprep.subr.bf16.mxu0 %v979_v5 }
  0x4c   :  { %779 = vmatmul.mubr.f32.gmra.mrb[2].mxu0 %v57_v39 }
  0x4d   :  { %781 = vmatprep.mubr.f32.mxu0 %v58_v40 }
  0x4e   :  { %982 = vmatpush3.bf16.msra.mxu0 %v979_v5 }
  0x4f   :  { %984 = vmatprep.subr.bf16.mxu0 %v1335_v8 }
  0x50   :  { %782 = vmatmul.mubr.f32.gmra.mrb[4].mxu0 %v59_v41 }
  0x51   :  { %784 = vmatprep.mubr.f32.mxu0 %v60_v42 }
  0x52   :  { %986 = vmatpush3.bf16.msra.mxu0 %v1335_v8 }
  0x53   :  { %988 = vmatprep.subr.bf16.mxu0 %v1338_v11 }
  0x54   :  { %785 = vmatmul.mubr.f32.gmra.mrb[6].mxu0 %v61_v43 }
  0x55   :  { %787 = vmatprep.mubr.f32.mxu0 %v62_v44 }
  0x56   :  { %990 = vmatpush3.bf16.msra.mxu0 %v1338_v11 }
  0x57   :  { %992 = vmatprep.subr.bf16.mxu0 %v991_v63 }
  0x58   :  { %788 = vmatmul.mubr.f32.gmra.mrb[8].mxu0 %v63_v45 }
  0x59   :  { %790 = vmatprep.mubr.f32.mxu0 %v64_v46 }
  0x5a   :  { %994 = vmatpush3.bf16.msra.mxu0 %v991_v63 }
  0x5b   :  { %996 = vmatprep.subr.bf16.mxu0 %v995_v2 }
  0x5c   :  { %791 = vmatmul.mubr.f32.gmra.mrb[10].mxu0 %v65_v47 }
  0x5d   :  { %793 = vmatprep.mubr.f32.mxu0 %v66_v48 }
  0x5e   :  { %998 = vmatpush3.bf16.msra.mxu0 %v995_v2 }
  0x60   :  { %794 = vmatmul.mubr.f32.gmra.mrb[12].mxu0 %v67_v49 }
  0x61   :  { %796 = vmatprep.mubr.f32.mxu0 %v68_v50 }
  0x64   :  { %797 = vmatmul.mubr.f32.gmra.mrb[14].mxu0 %v69_v51 }
 0x11b   :  { %v777_v13 = vpop.f32.mrb[0].mxu0 }
 0x11c   :  { %v165_v14 = vadd.f32 %v777_v13, %v1346_v12  ;;  %v159_v15 = vpop.f32.mrb[1].mxu0 }
 0x11d   :  { %v160_v16 = vadd.f32 %v1346_v12, %v159_v15 }
 0x11f   :  { %1027 = vtanh.f32 %v160_v16  ;;  %v780_v17 = vpop.f32.mrb[2].mxu0 }
 0x120   :  { %1029 = vtanh.f32 %v165_v14  ;;  %v175_v18 = vadd.f32 %v780_v17, %v1346_v12  ;;  %v169_v19 = vpop.f32.mrb[3].mxu0 }
 0x121   :  { %v170_v20 = vadd.f32 %v1346_v12, %v169_v19 }
 0x123   :  { %1031 = vtanh.f32 %v170_v20  ;;  %v783_v21 = vpop.f32.mrb[4].mxu0 }
 0x124   :  { %1033 = vtanh.f32 %v175_v18  ;;  %v185_v22 = vadd.f32 %v783_v21, %v1346_v12  ;;  %v179_v23 = vpop.f32.mrb[5].mxu0 }
 0x125   :  { %v180_v24 = vadd.f32 %v1346_v12, %v179_v23 }
 0x127   :  { %1035 = vtanh.f32 %v180_v24  ;;  %v786_v25 = vpop.f32.mrb[6].mxu0 }
 0x128   :  { %1037 = vtanh.f32 %v185_v22  ;;  %v195_v26 = vadd.f32 %v786_v25, %v1346_v12  ;;  %v189_v27 = vpop.f32.mrb[7].mxu0 }
 0x129   :  { %v1028_v28 = vpop.eup %1027  ;;  %v190_v29 = vadd.f32 %v1346_v12, %v189_v27 }
 0x12a   :  { %v1030_v30 = vpop.eup %1029  ;;  %831 = vmatprep.mubr.f32.mxu1 %v1028_v28 }
 0x12b   :  { %1039 = vtanh.f32 %v190_v29  ;;  %v789_v31 = vpop.f32.mrb[8].mxu0  ;;  %832 = vmatmul.mubr.f32.vlgmr.msra.gmra.mrb[0].mxu1 %v1030_v30 }
 0x12c   :  { %1041 = vtanh.f32 %v195_v26  ;;  %v205_v32 = vadd.f32 %v789_v31, %v1346_v12  ;;  %v199_v33 = vpop.f32.mrb[9].mxu0  ;;  %1015 = vmatpush3.bf16.msra.mxu1 %v975_v3  ;;  %v450_v3 = vld [vmem:[#allocation4 + $0x60] sm:$0xff] }
 0x12d   :  { %v1032_v34 = vpop.eup %1031  ;;  %v200_v35 = vadd.f32 %v1346_v12, %v199_v33  ;;  %1008 = vmatprep.subr.bf16.mxu1 %v979_v5 }
 0x12e   :  { %v1034_v36 = vpop.eup %1033  ;;  %834 = vmatprep.mubr.f32.mxu1 %v1032_v34 }
 0x12f   :  { %1043 = vtanh.f32 %v200_v35  ;;  %v792_v37 = vpop.f32.mrb[10].mxu0  ;;  %835 = vmatmul.mubr.f32.gmra.mrb[2].mxu1 %v1034_v36 }
 0x130   :  { %1045 = vtanh.f32 %v205_v32  ;;  %v215_v38 = vadd.f32 %v792_v37, %v1346_v12  ;;  %v209_v39 = vpop.f32.mrb[11].mxu0  ;;  %1016 = vmatpush3.bf16.msra.mxu1 %v979_v5  ;;  %v999_v5 = vpack.c.bf16 %v451_v4, %v450_v3 }
 0x131   :  { %v1036_v40 = vpop.eup %1035  ;;  %v210_v41 = vadd.f32 %v1346_v12, %v209_v39  ;;  %1009 = vmatprep.subr.bf16.mxu1 %v1335_v8 }
 0x132   :  { %v1038_v42 = vpop.eup %1037  ;;  %837 = vmatprep.mubr.f32.mxu1 %v1036_v40  ;;  %1000 = vmatprep.subr.bf16.mxu0 %v999_v5 }
 0x133   :  { %1047 = vtanh.f32 %v210_v41  ;;  %v795_v43 = vpop.f32.mrb[12].mxu0  ;;  %838 = vmatmul.mubr.f32.gmra.mrb[4].mxu1 %v1038_v42  ;;  %1002 = vmatpush3.bf16.msra.mxu0 %v999_v5 }
 0x134   :  { %1049 = vtanh.f32 %v215_v38  ;;  %v225_v44 = vadd.f32 %v795_v43, %v1346_v12  ;;  %v219_v45 = vpop.f32.mrb[13].mxu0  ;;  %1017 = vmatpush3.bf16.msra.mxu1 %v1335_v8  ;;  %v1003_v8 = vpack.c.bf16 %v453_v7, %v452_v6 }
 0x135   :  { %v1040_v46 = vpop.eup %1039  ;;  %v220_v47 = vadd.f32 %v1346_v12, %v219_v45  ;;  %1010 = vmatprep.subr.bf16.mxu1 %v1338_v11 }
 0x136   :  { %v1042_v48 = vpop.eup %1041  ;;  %840 = vmatprep.mubr.f32.mxu1 %v1040_v46  ;;  %1004 = vmatprep.subr.bf16.mxu0 %v1003_v8 }
 0x137   :  { %1051 = vtanh.f32 %v220_v47  ;;  %v798_v49 = vpop.f32.mrb[14].mxu0  ;;  %841 = vmatmul.mubr.f32.gmra.mrb[6].mxu1 %v1042_v48  ;;  %1006 = vmatpush3.bf16.msra.mxu0 %v1003_v8 }
 0x138   :  { %1053 = vtanh.f32 %v225_v44  ;;  %v235_v50 = vadd.f32 %v798_v49, %v1346_v12  ;;  %v229_v51 = vpop.f32.mrb[15].mxu0  ;;  %1018 = vmatpush3.bf16.msra.mxu1 %v1338_v11 }
 0x139   :  { %v1044_v52 = vpop.eup %1043  ;;  %v230_v53 = vadd.f32 %v1346_v12, %v229_v51  ;;  %1011 = vmatprep.subr.bf16.mxu1 %v991_v63 }
 0x13a   :  { %v1046_v54 = vpop.eup %1045  ;;  %843 = vmatprep.mubr.f32.mxu1 %v1044_v52 }
 0x13b   :  { %1055 = vtanh.f32 %v230_v53  ;;  %844 = vmatmul.mubr.f32.gmra.mrb[8].mxu1 %v1046_v54 }
 0x13c   :  { %1057 = vtanh.f32 %v235_v50  ;;  %1019 = vmatpush3.bf16.msra.mxu1 %v991_v63 }
 0x13d   :  { %v1048_v55 = vpop.eup %1047  ;;  %1012 = vmatprep.subr.bf16.mxu1 %v995_v2 }
 0x13e   :  { %v1050_v56 = vpop.eup %1049  ;;  %846 = vmatprep.mubr.f32.mxu1 %v1048_v55 }
 0x13f   :  { %847 = vmatmul.mubr.f32.gmra.mrb[10].mxu1 %v1050_v56 }
 0x140   :  { %1020 = vmatpush3.bf16.msra.mxu1 %v995_v2 }
 0x141   :  { %v1052_v57 = vpop.eup %1051  ;;  %1013 = vmatprep.subr.bf16.mxu1 %v999_v5 }
 0x142   :  { %v1054_v58 = vpop.eup %1053  ;;  %849 = vmatprep.mubr.f32.mxu1 %v1052_v57 }
 0x143   :  { %850 = vmatmul.mubr.f32.gmra.mrb[12].mxu1 %v1054_v58  ;;  %v1392_v58 = vld [vmem:[%s1464_s6] ss:$0 sm:$0xff] }
 0x144   :  { %1021 = vmatpush3.bf16.msra.mxu1 %v999_v5 }
 0x145   :  { %v1056_v59 = vpop.eup %1055  ;;  %1014 = vmatprep.subr.bf16.mxu1 %v1003_v8 }
 0x146   :  { %v1058_v60 = vpop.eup %1057  ;;  %852 = vmatprep.mubr.f32.mxu1 %v1056_v59 }
 0x147   :  { %853 = vmatmul.mubr.f32.gmra.mrb[14].mxu1 %v1058_v60 }
 0x148   :  { %1022 = vmatpush3.bf16.msra.mxu1 %v1003_v8 }
 0x1fe   :  { %v833_v10 = vpop.f32.mrb[0].mxu1 }
 0x1ff   :  { %v349_v11 = vadd.f32 %v833_v10, %v1371_v9  ;;  %v343_v12 = vpop.f32.mrb[1].mxu1 }
 0x200   :  { %v344_v13 = vadd.f32 %v1371_v9, %v343_v12 }
 0x202   :  { %1059 = vtanh.f32 %v344_v13  ;;  %v836_v14 = vpop.f32.mrb[2].mxu1 }
 0x203   :  { %1061 = vtanh.f32 %v349_v11  ;;  %v359_v15 = vadd.f32 %v836_v14, %v1371_v9  ;;  %v353_v16 = vpop.f32.mrb[3].mxu1 }
 0x204   :  { %v354_v17 = vadd.f32 %v1371_v9, %v353_v16 }
 0x206   :  { %1063 = vtanh.f32 %v354_v17  ;;  %v839_v18 = vpop.f32.mrb[4].mxu1 }
 0x207   :  { %1065 = vtanh.f32 %v359_v15  ;;  %v369_v19 = vadd.f32 %v839_v18, %v1371_v9  ;;  %v363_v20 = vpop.f32.mrb[5].mxu1 }
 0x208   :  { %v364_v21 = vadd.f32 %v1371_v9, %v363_v20 }
 0x20a   :  { %1067 = vtanh.f32 %v364_v21  ;;  %v842_v22 = vpop.f32.mrb[6].mxu1 }
 0x20b   :  { %1069 = vtanh.f32 %v369_v19  ;;  %v379_v23 = vadd.f32 %v842_v22, %v1371_v9  ;;  %v373_v24 = vpop.f32.mrb[7].mxu1 }
 0x20c   :  { %v1060_v25 = vpop.eup %1059  ;;  %v374_v26 = vadd.f32 %v1371_v9, %v373_v24 }
 0x20d   :  { %v1062_v27 = vpop.eup %1061  ;;  %887 = vmatprep.mubr.f32.mxu0 %v1060_v25 }
 0x20e   :  { %1071 = vtanh.f32 %v374_v26  ;;  %v845_v28 = vpop.f32.mrb[8].mxu1  ;;  %888 = vmatmul.mubr.f32.vlgmr.msra.gmra.mrb[16].mxu0 %v1062_v27 }
 0x20f   :  { %1073 = vtanh.f32 %v379_v23  ;;  %v389_v29 = vadd.f32 %v845_v28, %v1371_v9  ;;  %v383_v30 = vpop.f32.mrb[9].mxu1 }
 0x210   :  { %v1064_v31 = vpop.eup %1063  ;;  %v384_v32 = vadd.f32 %v1371_v9, %v383_v30 }
 0x211   :  { %v1066_v33 = vpop.eup %1065  ;;  %890 = vmatprep.mubr.f32.mxu0 %v1064_v31 }
 0x212   :  { %1075 = vtanh.f32 %v384_v32  ;;  %v848_v34 = vpop.f32.mrb[10].mxu1  ;;  %891 = vmatmul.mubr.f32.gmra.mrb[18].mxu0 %v1066_v33 }
 0x213   :  { %1077 = vtanh.f32 %v389_v29  ;;  %v399_v35 = vadd.f32 %v848_v34, %v1371_v9  ;;  %v393_v36 = vpop.f32.mrb[11].mxu1 }
 0x214   :  { %v1068_v37 = vpop.eup %1067  ;;  %v394_v38 = vadd.f32 %v1371_v9, %v393_v36 }
 0x215   :  { %v1070_v39 = vpop.eup %1069  ;;  %893 = vmatprep.mubr.f32.mxu0 %v1068_v37 }
 0x216   :  { %1079 = vtanh.f32 %v394_v38  ;;  %v851_v40 = vpop.f32.mrb[12].mxu1  ;;  %894 = vmatmul.mubr.f32.gmra.mrb[20].mxu0 %v1070_v39 }
 0x217   :  { %1081 = vtanh.f32 %v399_v35  ;;  %v409_v41 = vadd.f32 %v851_v40, %v1371_v9  ;;  %v403_v42 = vpop.f32.mrb[13].mxu1 }
 0x218   :  { %v1072_v43 = vpop.eup %1071  ;;  %v404_v44 = vadd.f32 %v1371_v9, %v403_v42 }
 0x219   :  { %v1074_v45 = vpop.eup %1073  ;;  %896 = vmatprep.mubr.f32.mxu0 %v1072_v43 }
 0x21a   :  { %1083 = vtanh.f32 %v404_v44  ;;  %v854_v46 = vpop.f32.mrb[14].mxu1  ;;  %897 = vmatmul.mubr.f32.gmra.mrb[22].mxu0 %v1074_v45 }
 0x21b   :  { %1085 = vtanh.f32 %v409_v41  ;;  %v419_v47 = vadd.f32 %v854_v46, %v1371_v9  ;;  %v413_v48 = vpop.f32.mrb[15].mxu1 }
 0x21c   :  { %v1076_v49 = vpop.eup %1075  ;;  %v414_v50 = vadd.f32 %v1371_v9, %v413_v48 }
 0x21d   :  { %v1078_v51 = vpop.eup %1077  ;;  %899 = vmatprep.mubr.f32.mxu1 %v1076_v49 }
 0x21e   :  { %1087 = vtanh.f32 %v414_v50  ;;  %900 = vmatmul.mubr.f32.vlgmr.msra.gmra.mrb[16].mxu1 %v1078_v51 }
 0x21f   :  { %1089 = vtanh.f32 %v419_v47 }
 0x220   :  { %v1080_v52 = vpop.eup %1079 }
 0x221   :  { %v1082_v53 = vpop.eup %1081  ;;  %902 = vmatprep.mubr.f32.mxu1 %v1080_v52 }
 0x222   :  { %903 = vmatmul.mubr.f32.gmra.mrb[18].mxu1 %v1082_v53 }
 0x224   :  { %v1084_v54 = vpop.eup %1083 }
 0x225   :  { %v1086_v55 = vpop.eup %1085  ;;  %905 = vmatprep.mubr.f32.mxu1 %v1084_v54 }
 0x226   :  { %906 = vmatmul.mubr.f32.gmra.mrb[20].mxu1 %v1086_v55 }
 0x228   :  { %v1088_v56 = vpop.eup %1087 }
 0x229   :  { %v1090_v57 = vpop.eup %1089  ;;  %908 = vmatprep.mubr.f32.mxu1 %v1088_v56 }
 0x22a   :  { %909 = vmatmul.mubr.f32.gmra.mrb[22].mxu1 %v1090_v57 }
 0x2e1   :  { %v889_v59 = vpop.f32.mrb[16].mxu0 }
 0x2e2   :  { %v533_v60 = vadd.f32 %v889_v59, %v1392_v58  ;;  %v527_v61 = vpop.f32.mrb[17].mxu0 }
 0x2e3   :  { %v528_v62 = vadd.f32 %v1392_v58, %v527_v61 }
 0x2e4   :  { %1091 = vtanh.f32 %v533_v60 }
 0x2e5   :  { %1093 = vtanh.f32 %v528_v62  ;;  %v892_v63 = vpop.f32.mrb[18].mxu0 }
 0x2e6   :  { %v543_v0 = vadd.f32 %v892_v63, %v1392_v58  ;;  %v537_v1 = vpop.f32.mrb[19].mxu0 }
 0x2e7   :  { %v538_v2 = vadd.f32 %v1392_v58, %v537_v1 }
 0x2e8   :  { %1095 = vtanh.f32 %v543_v0 }
 0x2e9   :  { %1097 = vtanh.f32 %v538_v2  ;;  %v895_v3 = vpop.f32.mrb[20].mxu0 }
 0x2ea   :  { %v553_v4 = vadd.f32 %v895_v3, %v1392_v58  ;;  %v547_v5 = vpop.f32.mrb[21].mxu0 }
 0x2eb   :  { %v548_v6 = vadd.f32 %v1392_v58, %v547_v5 }
 0x2ec   :  { %1099 = vtanh.f32 %v553_v4 }
 0x2ed   :  { %1101 = vtanh.f32 %v548_v6  ;;  %v898_v7 = vpop.f32.mrb[22].mxu0 }
 0x2ee   :  { %v1092_v8 = vpop.eup %1091  ;;  %v563_v9 = vadd.f32 %v898_v7, %v1392_v58  ;;  %v557_v10 = vpop.f32.mrb[23].mxu0 }
 0x2ef   :  { %v1094_v11 = vpop.eup %1093  ;;  %623 = vst [vmem:[%s1465_s7 + $0x8] sm:$0xff] %v1092_v8  ;;  %v558_v12 = vadd.f32 %v1392_v58, %v557_v10 }
 0x2f0   :  { %622 = vst [vmem:[%s1465_s7] sm:$0xff] %v1094_v11  ;;  %1103 = vtanh.f32 %v563_v9 }
 0x2f1   :  { %1105 = vtanh.f32 %v558_v12  ;;  %v901_v13 = vpop.f32.mrb[16].mxu1 }
 0x2f2   :  { %v1096_v14 = vpop.eup %1095  ;;  %v573_v15 = vadd.f32 %v901_v13, %v1392_v58  ;;  %v567_v16 = vpop.f32.mrb[17].mxu1 }
 0x2f3   :  { %v1098_v17 = vpop.eup %1097  ;;  %625 = vst [vmem:[%s1465_s7 + $0x18] sm:$0xff] %v1096_v14  ;;  %v568_v18 = vadd.f32 %v1392_v58, %v567_v16 }
 0x2f4   :  { %624 = vst [vmem:[%s1465_s7 + $0x10] sm:$0xff] %v1098_v17  ;;  %1107 = vtanh.f32 %v573_v15 }
 0x2f5   :  { %1109 = vtanh.f32 %v568_v18  ;;  %v904_v19 = vpop.f32.mrb[18].mxu1 }
 0x2f6   :  { %v1100_v20 = vpop.eup %1099  ;;  %v583_v21 = vadd.f32 %v904_v19, %v1392_v58  ;;  %v577_v22 = vpop.f32.mrb[19].mxu1 }
 0x2f7   :  { %v1102_v23 = vpop.eup %1101  ;;  %627 = vst [vmem:[%s1465_s7 + $0x28] sm:$0xff] %v1100_v20  ;;  %v578_v24 = vadd.f32 %v1392_v58, %v577_v22 }
 0x2f8   :  { %626 = vst [vmem:[%s1465_s7 + $0x20] sm:$0xff] %v1102_v23  ;;  %1111 = vtanh.f32 %v583_v21 }
 0x2f9   :  { %1113 = vtanh.f32 %v578_v24  ;;  %v907_v25 = vpop.f32.mrb[20].mxu1 }
 0x2fa   :  { %v1104_v26 = vpop.eup %1103  ;;  %v593_v27 = vadd.f32 %v907_v25, %v1392_v58  ;;  %v587_v28 = vpop.f32.mrb[21].mxu1 }
 0x2fb   :  { %v1106_v29 = vpop.eup %1105  ;;  %629 = vst [vmem:[%s1465_s7 + $0x38] sm:$0xff] %v1104_v26  ;;  %v588_v30 = vadd.f32 %v1392_v58, %v587_v28 }
 0x2fc   :  { %628 = vst [vmem:[%s1465_s7 + $0x30] sm:$0xff] %v1106_v29  ;;  %1115 = vtanh.f32 %v593_v27 }
 0x2fd   :  { %1117 = vtanh.f32 %v588_v30  ;;  %v910_v31 = vpop.f32.mrb[22].mxu1 }
 0x2fe   :  { %v1108_v32 = vpop.eup %1107  ;;  %v603_v33 = vadd.f32 %v910_v31, %v1392_v58  ;;  %v597_v34 = vpop.f32.mrb[23].mxu1 }
 0x2ff   :  { %v1110_v35 = vpop.eup %1109  ;;  %631 = vst [vmem:[%s1465_s7 + $0x48] sm:$0xff] %v1108_v32  ;;  %v598_v36 = vadd.f32 %v1392_v58, %v597_v34 }
 0x300   :  { %630 = vst [vmem:[%s1465_s7 + $0x40] sm:$0xff] %v1110_v35  ;;  %1119 = vtanh.f32 %v603_v33 }
 0x301   :  { %1121 = vtanh.f32 %v598_v36 }
 0x302   :  { %v1112_v37 = vpop.eup %1111 }
 0x303   :  { %v1114_v38 = vpop.eup %1113  ;;  %633 = vst [vmem:[%s1465_s7 + $0x58] sm:$0xff] %v1112_v37 }
 0x304   :  { %632 = vst [vmem:[%s1465_s7 + $0x50] sm:$0xff] %v1114_v38 }
 0x306   :  { %v1116_v39 = vpop.eup %1115 }
 0x307   :  { %v1118_v40 = vpop.eup %1117  ;;  %635 = vst [vmem:[%s1465_s7 + $0x68] sm:$0xff] %v1116_v39 }
 0x308   :  { %634 = vst [vmem:[%s1465_s7 + $0x60] sm:$0xff] %v1118_v40 }
 0x30a   :  { %v1120_v41 = vpop.eup %1119 }
 0x30b   :  { %v1122_v42 = vpop.eup %1121  ;;  %637 = vst [vmem:[%s1465_s7 + $0x78] sm:$0xff] %v1120_v41 }
 0x30c   :  { %636 = vst [vmem:[%s1465_s7 + $0x70] sm:$0xff] %v1122_v42 }
 0x30d   :  { %642 = vsyncpa [#allocation3], 1 }
 0x30e   :  { %643 = vsyncpa [#allocation5], 1 }

</bundles_post_ra>
